<compile_context>
chip_gen: v7x
topology: tpu7x:2x2x1
jax: 0.10.0
libtpu: 0.0.40
codegen_flags: <defaults>
</compile_context>

<pallas_src>
import functools
import math

import jax
import jax.numpy as jnp
from jax import lax
from jax.experimental import pallas as pl
from jax.experimental.pallas import tpu as pltpu


def _he_scale(w_oihw):
    """Equalized-LR (He) constant: sqrt(2 / fan_in), fan_in = Cin * Kh * Kw."""
    return math.sqrt(2.0 / (w_oihw.shape[1] * w_oihw.shape[2] * w_oihw.shape[3]))


def _banded_weights(w_hwio, W):
    """(3, 3, Ci, Co) HWIO conv weight -> (3, W*Ci, W*Co) block-banded weights.

    With the image stored lane-packed as X[h, w*Ci + ci], a stride-1 / pad-1
    3x3 conv is   Y[h, :] = sum_ky shift_ky(X)[h, :] @ B[ky]   where
      B[ky, ws*Ci + ci, wd*Co + co] = w_hwio[ky, ws - wd + 1, ci, co]
    for |ws - wd| <= 1 (zero elsewhere).  Horizontal zero-padding is implicit:
    out-of-range source columns simply have no band entry.
    """
    kh, kw, Ci, Co = w_hwio.shape
    ws = jnp.arange(W)
    wd = jnp.arange(W)
    kx = jnp.arange(kw)
    # ind[x, s, d] == 1  iff  s == d + x - 1   (pad = 1)
    ind = (ws[None, :, None] == (wd[None, None, :] + kx[:, None, None] - 1))
    ind = ind.astype(w_hwio.dtype)
    B = jnp.einsum('xsd,yxio->ysido', ind, w_hwio)        # (kh, W, Ci, W, Co)
    return B.reshape(kh, W * Ci, W * Co)


def _pick_block_batch(N, H, target_rows=256, min_grid_steps=2):
    """Largest Nb dividing N with Nb*H <= target_rows, keeping >= min_grid_steps
    grid steps when N allows (so the parallel batch axis still feeds both v7x
    TensorCores).  target_rows=256 fills a v6e/v7x MXU pass and is a multiple of
    128, so v5e is saturated as well."""
    divisors = [d for d in range(1, N + 1) if N % d == 0]
    fits = [d for d in divisors if d * H <= target_rows]
    keeps_steps = [d for d in fits if N // d >= min_grid_steps]
    if keeps_steps:
        return max(keeps_steps)
    if fits:
        return max(fits)
    return 1


def _dconvblock_kernel(x_ref, w1_ref, b1_ref, w2_ref, b2_ref, o_ref, *,
                       neg_slope, H):
    """One grid step = a slab of Nb images, fully lane-packed.

    x_ref : (Nb*H, W*Cin)       bf16 activations, channels folded onto lanes
    w1_ref: (3, W*Cin, W*Cin)   bf16 banded weights of Conv_1 (scale folded in)
    b1_ref: (1, W*Cin)          f32 lane-replicated, pre-scaled bias of Conv_1
    w2_ref: (3, W*Cin, W*Cout)  bf16 banded weights of Conv_2 (scale folded in)
    b2_ref: (1, W*Cout)         f32 lane-replicated, pre-scaled bias of Conv_2
    o_ref : (Nb*H, W*Cout)      output (lane-dense last dim)
    """

    def conv3x3(inp_bf16, w_ref, b_ref):
        R = inp_bf16.shape[0]
        # One bf16 activation operand feeds all three ky matmuls; the vertical
        # shifts are applied to the f32 results (roll commutes with a row-wise
        # matmul), using non-negative shifts only.
        p0 = jnp.dot(inp_bf16, w_ref[0], preferred_element_type=jnp.float32)
        p1 = jnp.dot(inp_bf16, w_ref[1], preferred_element_type=jnp.float32)
        p2 = jnp.dot(inp_bf16, w_ref[2], preferred_element_type=jnp.float32)

        row = lax.broadcasted_iota(jnp.int32, p1.shape, 0)
        if (H & (H - 1)) == 0:                       # H is a power of two
            row_in_img = jnp.bitwise_and(row, H - 1)
        else:
            row_in_img = row % H
        top = row_in_img == 0                        # first row of each image
        bot = row_in_img == (H - 1)                  # last row of each image

        # up[h] = (x @ W_ky0)[h-1]  (zero at image-top rows: vertical padding)
        up = jnp.where(top, 0.0, pltpu.roll(p0, shift=1, axis=0))
        # dn[h] = (x @ W_ky2)[h+1]  == roll by R-1 (shift must be non-negative)
        dn = jnp.where(bot, 0.0, pltpu.roll(p2, shift=R - 1, axis=0))

        y = up + p1 + dn + b_ref[...]                # scale already folded in
        return jnp.where(y >= 0, y, neg_slope * y)   # LeakyReLU(neg_slope)

    x = x_ref[...]                                   # (Nb*H, W*Cin) bf16
    y = conv3x3(x, w1_ref, b1_ref)                   # (Nb*H, W*Cin) f32
    z = conv3x3(y.astype(jnp.bfloat16), w2_ref, b2_ref)   # (Nb*H, W*Cout) f32
    o_ref[...] = z.astype(o_ref.dtype)


def d_conv_block(x_nchw, w1_oihw, b1, w2_oihw, b2, neg_slope=0.2,
                 block_batch=None):
    """Pallas implementation of D_ConvBlock.forward (first_layer=False)."""
    N, Cin, H, W = x_nchw.shape
    Cout = w2_oihw.shape[0]
    assert w1_oihw.shape == (Cin, Cin, 3, 3)
    assert w2_oihw.shape[1:] == (Cin, 3, 3)

    # Per-weight equalized-LR constants (conv2's fan_in derived from w2 itself).
    scale1 = _he_scale(w1_oihw)
    scale2 = _he_scale(w2_oihw)

    Nb = _pick_block_batch(N, H) if block_batch is None else block_batch
    assert N % Nb == 0
    grid = (N // Nb,)

    # Layout plumbing (outside the kernel): NCHW -> lane-packed (N*H, W*C) bf16
    # (cast fused into the transpose so the kernel DMAs bf16 activations).
    # TODO(synk): between consecutive D_ConvBlocks keep this packed layout
    #             instead of round-tripping through NCHW every call.
    x_flat = (jnp.transpose(x_nchw, (0, 2, 3, 1))
              .reshape(N * H, W * Cin)
              .astype(jnp.bfloat16))

    # OIHW -> HWIO, fold the equalized scale into the f32 weights *before* the
    # bf16 cast, build block-banded matrices; biases lane-replicated + scaled.
    w1_hwio = jnp.transpose(w1_oihw, (2, 3, 1, 0)).astype(jnp.float32) * scale1
    w2_hwio = jnp.transpose(w2_oihw, (2, 3, 1, 0)).astype(jnp.float32) * scale2
    w1_band = _banded_weights(w1_hwio, W).astype(jnp.bfloat16)
    w2_band = _banded_weights(w2_hwio, W).astype(jnp.bfloat16)
    b1_flat = jnp.tile(b1.astype(jnp.float32) * scale1, W).reshape(1, W * Cin)
    b2_flat = jnp.tile(b2.astype(jnp.float32) * scale2, W).reshape(1, W * Cout)

    kernel = functools.partial(_dconvblock_kernel,
                               neg_slope=neg_slope, H=H)

    out_flat = pl.pallas_call(
        kernel,
        out_shape=jax.ShapeDtypeStruct((N * H, W * Cout), x_nchw.dtype),
        grid_spec=pltpu.PrefetchScalarGridSpec(
            num_scalar_prefetch=0,
            grid=grid,
            in_specs=[
                pl.BlockSpec((Nb * H, W * Cin), lambda n: (n, 0)),
                pl.BlockSpec((3, W * Cin, W * Cin), lambda n: (0, 0, 0)),
                pl.BlockSpec((1, W * Cin), lambda n: (0, 0)),
                pl.BlockSpec((3, W * Cin, W * Cout), lambda n: (0, 0, 0)),
                pl.BlockSpec((1, W * Cout), lambda n: (0, 0)),
            ],
            out_specs=pl.BlockSpec((Nb * H, W * Cout), lambda n: (n, 0)),
        ),
        compiler_params=pltpu.CompilerParams(
            dimension_semantics=("parallel",)),
    )(x_flat, w1_band, b1_flat, w2_band, b2_flat)

    # (N*H, W*Cout) -> NCHW
    return jnp.transpose(out_flat.reshape(N, H, W, Cout), (0, 3, 1, 2))


def _reference_forward(x, w1, b1, w2, b2, neg_slope=0.2):
    """Pure-JAX NCHW reference mirroring the PyTorch module (f32, HIGHEST)."""
    scale1 = _he_scale(w1)
    scale2 = _he_scale(w2)
    dn = ('NCHW', 'OIHW', 'NCHW')
    y = lax.conv_general_dilated(x, w1, (1, 1), ((1, 1), (1, 1)),
                                 dimension_numbers=dn,
                                 precision=lax.Precision.HIGHEST)
    y = (y + b1.reshape(1, -1, 1, 1)) * scale1
    y = jnp.where(y >= 0, y, neg_slope * y)
    z = lax.conv_general_dilated(y, w2, (1, 1), ((1, 1), (1, 1)),
                                 dimension_numbers=dn,
                                 precision=lax.Precision.HIGHEST)
    z = (z + b2.reshape(1, -1, 1, 1)) * scale2
    z = jnp.where(z >= 0, z, neg_slope * z)
    return z


if __name__ == "__main__":
    # N=8 so the batched-block path is exercised (Nb=4 -> M=64 rows/step,
    # grid=(2,) keeps both v7x TensorCores busy) while shapes stay small.
    N, Cin, Cout, H, W = 8, 4, 8, 16, 16

    key = jax.random.PRNGKey(0)
    kx, kw1, kb1, kw2, kb2 = jax.random.split(key, 5)

    x = jax.random.normal(kx, (N, Cin, H, W), dtype=jnp.float32)
    # Equalized init draws weights ~ N(0, 1); use small nonzero biases so the
    # (conv + b) * scale path is actually exercised.
    w1 = jax.random.normal(kw1, (Cin, Cin, 3, 3), dtype=jnp.float32)   # OIHW
    b1 = 0.1 * jax.random.normal(kb1, (Cin,), dtype=jnp.float32)
    w2 = jax.random.normal(kw2, (Cout, Cin, 3, 3), dtype=jnp.float32)  # OIHW
    b2 = 0.1 * jax.random.normal(kb2, (Cout,), dtype=jnp.float32)

    out = jax.block_until_ready(d_conv_block(x, w1, b1, w2, b2))
    ref = jax.block_until_ready(_reference_forward(x, w1, b1, w2, b2))

    # Intentional precision tradeoff: bf16 activations/weights on the MXU with
    # f32 accumulation, compared against an f32 HIGHEST-precision reference.
    if not bool(jnp.allclose(out, ref, rtol=3e-2, atol=1e-1)):
        err = float(jnp.max(jnp.abs(out - ref)))
        raise AssertionError(
            f"Pallas D_ConvBlock output mismatch vs reference (max abs err {err})")

    print("KERNEL_OK")
</pallas_src>

<mosaic_0001>
module attributes {stable_mosaic.version = 11 : i64} {
  func.func @_dconvblock_kernel(%arg0: i32, %arg1: memref<64x64xbf16, #tpu.memory_space<vmem>>, %arg2: memref<3x64x64xbf16, #tpu.memory_space<vmem>>, %arg3: memref<1x64xf32, #tpu.memory_space<vmem>>, %arg4: memref<3x64x128xbf16, #tpu.memory_space<vmem>>, %arg5: memref<1x128xf32, #tpu.memory_space<vmem>>, %arg6: memref<64x128xf32, #tpu.memory_space<vmem>>) attributes {dimension_semantics = [#tpu.dimension_semantics<parallel>], iteration_bounds = array<i64: 2>, scalar_prefetch = 0 : i64, scratch_operands = 0 : i64, tpu.core_type = #tpu.core_type<tc>, window_params = [{transform_indices = @transform_0, window_bounds = array<i64: 64, 64>}, {pipeline_mode = #tpu.pipeline_mode<synchronous>, transform_indices = @transform_1, window_bounds = array<i64: 3, 64, 64>}, {pipeline_mode = #tpu.pipeline_mode<synchronous>, transform_indices = @transform_2, window_bounds = array<i64: 1, 64>}, {pipeline_mode = #tpu.pipeline_mode<synchronous>, transform_indices = @transform_3, window_bounds = array<i64: 3, 64, 128>}, {pipeline_mode = #tpu.pipeline_mode<synchronous>, transform_indices = @transform_4, window_bounds = array<i64: 1, 128>}, {transform_indices = @transform_5, window_bounds = array<i64: 64, 128>}]} {
    %c0 = arith.constant 0 : index
    %c0_0 = arith.constant 0 : index
    %0 = vector.load %arg1[%c0, %c0_0] : memref<64x64xbf16, #tpu.memory_space<vmem>>, vector<64x64xbf16>
    %c0_1 = arith.constant 0 : index
    %c0_2 = arith.constant 0 : index
    %c0_3 = arith.constant 0 : index
    %1 = vector.load %arg2[%c0_1, %c0_2, %c0_3] : memref<3x64x64xbf16, #tpu.memory_space<vmem>>, vector<1x64x64xbf16>
    %2 = vector.shape_cast %1 : vector<1x64x64xbf16> to vector<64x64xbf16>
    %cst = arith.constant dense<0.000000e+00> : vector<64x64xf32>
    %3 = tpu.matmul %0, %2, %cst {dimension_numbers = #tpu.dot_dimension_numbers<[1], [0], [0], [1], [0, 0, 1, 1], [], []>} : vector<64x64xbf16>, vector<64x64xbf16>, vector<64x64xf32> -> vector<64x64xf32>
    %c1 = arith.constant 1 : index
    %c0_4 = arith.constant 0 : index
    %c0_5 = arith.constant 0 : index
    %4 = vector.load %arg2[%c1, %c0_4, %c0_5] : memref<3x64x64xbf16, #tpu.memory_space<vmem>>, vector<1x64x64xbf16>
    %5 = vector.shape_cast %4 : vector<1x64x64xbf16> to vector<64x64xbf16>
    %cst_6 = arith.constant dense<0.000000e+00> : vector<64x64xf32>
    %6 = tpu.matmul %0, %5, %cst_6 {dimension_numbers = #tpu.dot_dimension_numbers<[1], [0], [0], [1], [0, 0, 1, 1], [], []>} : vector<64x64xbf16>, vector<64x64xbf16>, vector<64x64xf32> -> vector<64x64xf32>
    %c2 = arith.constant 2 : index
    %c0_7 = arith.constant 0 : index
    %c0_8 = arith.constant 0 : index
    %7 = vector.load %arg2[%c2, %c0_7, %c0_8] : memref<3x64x64xbf16, #tpu.memory_space<vmem>>, vector<1x64x64xbf16>
    %8 = vector.shape_cast %7 : vector<1x64x64xbf16> to vector<64x64xbf16>
    %cst_9 = arith.constant dense<0.000000e+00> : vector<64x64xf32>
    %9 = tpu.matmul %0, %8, %cst_9 {dimension_numbers = #tpu.dot_dimension_numbers<[1], [0], [0], [1], [0, 0, 1, 1], [], []>} : vector<64x64xbf16>, vector<64x64xbf16>, vector<64x64xf32> -> vector<64x64xf32>
    %10 = tpu.iota {dimensions = array<i32: 0>} : vector<64x64xi32>
    %c15_i32 = arith.constant 15 : i32
    %11 = vector.broadcast %c15_i32 : i32 to vector<64x64xi32>
    %12 = arith.andi %10, %11 : vector<64x64xi32>
    %c0_i32 = arith.constant 0 : i32
    %13 = vector.broadcast %c0_i32 : i32 to vector<64x64xi32>
    %14 = arith.cmpi eq, %12, %13 : vector<64x64xi32>
    %c15_i32_10 = arith.constant 15 : i32
    %15 = vector.broadcast %c15_i32_10 : i32 to vector<64x64xi32>
    %16 = arith.cmpi eq, %12, %15 : vector<64x64xi32>
    %c1_i32 = arith.constant 1 : i32
    %17 = tpu.dynamic_rotate %3 by %c1_i32 dim 0 : vector<64x64xf32>, i32 -> vector<64x64xf32>
    %cst_11 = arith.constant 0.000000e+00 : f32
    %18 = vector.broadcast %cst_11 : f32 to vector<64x64xf32>
    %19 = arith.select %14, %18, %17 : vector<64x64xi1>, vector<64x64xf32>
    %c63_i32 = arith.constant 63 : i32
    %20 = tpu.dynamic_rotate %9 by %c63_i32 dim 0 : vector<64x64xf32>, i32 -> vector<64x64xf32>
    %cst_12 = arith.constant 0.000000e+00 : f32
    %21 = vector.broadcast %cst_12 : f32 to vector<64x64xf32>
    %22 = arith.select %16, %21, %20 : vector<64x64xi1>, vector<64x64xf32>
    %23 = arith.addf %19, %6 : vector<64x64xf32>
    %24 = arith.addf %23, %22 : vector<64x64xf32>
    %c0_13 = arith.constant 0 : index
    %c0_14 = arith.constant 0 : index
    %25 = vector.load %arg3[%c0_13, %c0_14] : memref<1x64xf32, #tpu.memory_space<vmem>>, vector<1x64xf32>
    %26 = vector.broadcast %25 : vector<1x64xf32> to vector<64x64xf32>
    %27 = arith.addf %24, %26 : vector<64x64xf32>
    %cst_15 = arith.constant 0.000000e+00 : f32
    %28 = vector.broadcast %cst_15 : f32 to vector<64x64xf32>
    %29 = arith.cmpf oge, %27, %28 : vector<64x64xf32>
    %cst_16 = arith.constant 2.000000e-01 : f32
    %30 = vector.broadcast %cst_16 : f32 to vector<64x64xf32>
    %31 = arith.mulf %30, %27 : vector<64x64xf32>
    %32 = arith.select %29, %27, %31 : vector<64x64xi1>, vector<64x64xf32>
    %33 = arith.truncf %32 : vector<64x64xf32> to vector<64x64xbf16>
    %c0_17 = arith.constant 0 : index
    %c0_18 = arith.constant 0 : index
    %c0_19 = arith.constant 0 : index
    %34 = vector.load %arg4[%c0_17, %c0_18, %c0_19] : memref<3x64x128xbf16, #tpu.memory_space<vmem>>, vector<1x64x128xbf16>
    %35 = vector.shape_cast %34 : vector<1x64x128xbf16> to vector<64x128xbf16>
    %cst_20 = arith.constant dense<0.000000e+00> : vector<64x128xf32>
    %36 = tpu.matmul %33, %35, %cst_20 {dimension_numbers = #tpu.dot_dimension_numbers<[1], [0], [0], [1], [0, 0, 1, 1], [], []>} : vector<64x64xbf16>, vector<64x128xbf16>, vector<64x128xf32> -> vector<64x128xf32>
    %c1_21 = arith.constant 1 : index
    %c0_22 = arith.constant 0 : index
    %c0_23 = arith.constant 0 : index
    %37 = vector.load %arg4[%c1_21, %c0_22, %c0_23] : memref<3x64x128xbf16, #tpu.memory_space<vmem>>, vector<1x64x128xbf16>
    %38 = vector.shape_cast %37 : vector<1x64x128xbf16> to vector<64x128xbf16>
    %cst_24 = arith.constant dense<0.000000e+00> : vector<64x128xf32>
    %39 = tpu.matmul %33, %38, %cst_24 {dimension_numbers = #tpu.dot_dimension_numbers<[1], [0], [0], [1], [0, 0, 1, 1], [], []>} : vector<64x64xbf16>, vector<64x128xbf16>, vector<64x128xf32> -> vector<64x128xf32>
    %c2_25 = arith.constant 2 : index
    %c0_26 = arith.constant 0 : index
    %c0_27 = arith.constant 0 : index
    %40 = vector.load %arg4[%c2_25, %c0_26, %c0_27] : memref<3x64x128xbf16, #tpu.memory_space<vmem>>, vector<1x64x128xbf16>
    %41 = vector.shape_cast %40 : vector<1x64x128xbf16> to vector<64x128xbf16>
    %cst_28 = arith.constant dense<0.000000e+00> : vector<64x128xf32>
    %42 = tpu.matmul %33, %41, %cst_28 {dimension_numbers = #tpu.dot_dimension_numbers<[1], [0], [0], [1], [0, 0, 1, 1], [], []>} : vector<64x64xbf16>, vector<64x128xbf16>, vector<64x128xf32> -> vector<64x128xf32>
    %43 = tpu.iota {dimensions = array<i32: 0>} : vector<64x128xi32>
    %c15_i32_29 = arith.constant 15 : i32
    %44 = vector.broadcast %c15_i32_29 : i32 to vector<64x128xi32>
    %45 = arith.andi %43, %44 : vector<64x128xi32>
    %c0_i32_30 = arith.constant 0 : i32
    %46 = vector.broadcast %c0_i32_30 : i32 to vector<64x128xi32>
    %47 = arith.cmpi eq, %45, %46 : vector<64x128xi32>
    %c15_i32_31 = arith.constant 15 : i32
    %48 = vector.broadcast %c15_i32_31 : i32 to vector<64x128xi32>
    %49 = arith.cmpi eq, %45, %48 : vector<64x128xi32>
    %c1_i32_32 = arith.constant 1 : i32
    %50 = tpu.dynamic_rotate %36 by %c1_i32_32 dim 0 : vector<64x128xf32>, i32 -> vector<64x128xf32>
    %cst_33 = arith.constant 0.000000e+00 : f32
    %51 = vector.broadcast %cst_33 : f32 to vector<64x128xf32>
    %52 = arith.select %47, %51, %50 : vector<64x128xi1>, vector<64x128xf32>
    %c63_i32_34 = arith.constant 63 : i32
    %53 = tpu.dynamic_rotate %42 by %c63_i32_34 dim 0 : vector<64x128xf32>, i32 -> vector<64x128xf32>
    %cst_35 = arith.constant 0.000000e+00 : f32
    %54 = vector.broadcast %cst_35 : f32 to vector<64x128xf32>
    %55 = arith.select %49, %54, %53 : vector<64x128xi1>, vector<64x128xf32>
    %56 = arith.addf %52, %39 : vector<64x128xf32>
    %57 = arith.addf %56, %55 : vector<64x128xf32>
    %c0_36 = arith.constant 0 : index
    %c0_37 = arith.constant 0 : index
    %58 = vector.load %arg5[%c0_36, %c0_37] : memref<1x128xf32, #tpu.memory_space<vmem>>, vector<1x128xf32>
    %59 = vector.broadcast %58 : vector<1x128xf32> to vector<64x128xf32>
    %60 = arith.addf %57, %59 : vector<64x128xf32>
    %cst_38 = arith.constant 0.000000e+00 : f32
    %61 = vector.broadcast %cst_38 : f32 to vector<64x128xf32>
    %62 = arith.cmpf oge, %60, %61 : vector<64x128xf32>
    %cst_39 = arith.constant 2.000000e-01 : f32
    %63 = vector.broadcast %cst_39 : f32 to vector<64x128xf32>
    %64 = arith.mulf %63, %60 : vector<64x128xf32>
    %65 = arith.select %62, %60, %64 : vector<64x128xi1>, vector<64x128xf32>
    %c0_40 = arith.constant 0 : index
    %c0_41 = arith.constant 0 : index
    %66 = vector.load %arg6[%c0_40, %c0_41] : memref<64x128xf32, #tpu.memory_space<vmem>>, vector<64x128xf32>
    tpu.vector_store %arg6[%c0_40, %c0_41], %65 {strides = array<i32>} : memref<64x128xf32, #tpu.memory_space<vmem>>, vector<64x128xf32>,
    return
  }
  func.func @transform_0(%arg0: i32) -> (i32, i32) {
    %c0_i32 = arith.constant 0 : i32
    %c0_i32_0 = arith.constant 0 : i32
    return %arg0, %c0_i32 : i32, i32
  }
  func.func @transform_1(%arg0: i32) -> (i32, i32, i32) {
    %c0_i32 = arith.constant 0 : i32
    %c0_i32_0 = arith.constant 0 : i32
    %c0_i32_1 = arith.constant 0 : i32
    %c0_i32_2 = arith.constant 0 : i32
    return %c0_i32, %c0_i32_0, %c0_i32_1 : i32, i32, i32
  }
  func.func @transform_2(%arg0: i32) -> (i32, i32) {
    %c0_i32 = arith.constant 0 : i32
    %c0_i32_0 = arith.constant 0 : i32
    %c0_i32_1 = arith.constant 0 : i32
    return %c0_i32, %c0_i32_0 : i32, i32
  }
  func.func @transform_3(%arg0: i32) -> (i32, i32, i32) {
    %c0_i32 = arith.constant 0 : i32
    %c0_i32_0 = arith.constant 0 : i32
    %c0_i32_1 = arith.constant 0 : i32
    %c0_i32_2 = arith.constant 0 : i32
    return %c0_i32, %c0_i32_0, %c0_i32_1 : i32, i32, i32
  }
  func.func @transform_4(%arg0: i32) -> (i32, i32) {
    %c0_i32 = arith.constant 0 : i32
    %c0_i32_0 = arith.constant 0 : i32
    %c0_i32_1 = arith.constant 0 : i32
    return %c0_i32, %c0_i32_0 : i32, i32
  }
  func.func @transform_5(%arg0: i32) -> (i32, i32) {
    %c0_i32 = arith.constant 0 : i32
    %c0_i32_0 = arith.constant 0 : i32
    return %arg0, %c0_i32 : i32, i32
  }
}

</mosaic_0001>

<bundles_post_ra>
// kernel: tpu_custom_call.1
= control target key start
LH: loop header
LB: loop body
LE: loop exit
PB: predicated region body
PF: predicated region fallthrough
CT: control target
= control target key end

     0   :  { %10 = vsyncpa [#allocation3], 0  ;;  %s2054_s0 = inlined_call_operand.vmem [shape: bf16[128,64], index: 0, kind: input, shape index: {}]   ;;  %s2055_s1 = inlined_call_operand.vmem [shape: bf16[3,64,64], index: 1, kind: input, shape index: {}]   ;;  %s2056_s2 = inlined_call_operand.vmem [shape: f32[1,64], index: 2, kind: input, shape index: {}]   ;;  %s2057_s3 = inlined_call_operand.hbm [shape: bf16[3,64,128], index: 3, kind: input, shape index: {}]   ;;  %s2058_s4 = inlined_call_operand.vmem [shape: f32[1,128], index: 4, kind: input, shape index: {}]   ;;  %s2059_s5 = inlined_call_operand.hbm [shape: f32[128,128], index: 5, kind: output, shape index: {}]  }
   0x1   :  { %11 = vsyncpa [#allocation4], 0 }
   0x2   :  { %13 = vsyncpa [#allocation4 + $0x1], 0  ;;  %s1665_s18 = smov 0   ;;  %s1667_s19 = smov 0  }
   0x3   :  { %s1669_s20 = smov 0   ;;  %s1671_s21 = smov 0  }
   0x4 LB: > { %s1686_s22 = sadd.s32 4294967295, %s1627_s21   ;;  %s1222_s23 = sadd.s32 4294967294, %s1627_s21   ;;  %s1627_s21 = sphi %s1671_s21, %s2100_s21   ;;  %s1623_s20 = sphi %s1669_s20, %s2099_s20   ;;  %s1619_s19 = sphi %s1667_s19, %s2098_s19   ;;  %s1615_s18 = sphi %s1665_s18, %s2097_s18  }
   0x5   : > { %s1690_s24 = sadd.s32 1, %s1627_s21   ;;  %s136_s25 = sadd.s32 1, %s1623_s20 }
   0x6   : > { %s133_s26 = ssub.s32 %s1627_s21, %s1690_s24  ;;  %p146_p0 = scmp.ne.s32.totalorder %s1623_s20, %s1619_s19 }
   0x7   : > { %p134_p1 = scmp.eq.s32.totalorder %s133_s26, 0  ;;  %p147_p2 = scmp.eq.s32.totalorder %s1686_s22, 1 }
   0x8   : > { %p152_p3 = scmp.ne.s32.totalorder %s1619_s19, %s1615_s18  ;;  %p153_p4 = scmp.eq.s32.totalorder %s1222_s23, 1 }
   0x9   : > { %s1701_s27 = scalar_select %p134_p1, %s1623_s20, %s136_s25  }
   0xa   : > { %p1703_p5 = por %p147_p2, %p146_p0  ;;  %p1707_p6 = por %p153_p4, %p152_p3 }
   0xb   : > { %p1223_p7 = scmp.ge.s32.totalorder %s1627_s21, 1  ;;  %p160_p8 = scmp.lt.s32.totalorder %s1627_s21, 3 }
   0xc   : > { %s2064_s28 = scalar_select %p1703_p5, 1, 0 }
   0xd   : > { %s2065_s29 = scalar_select %p1707_p6, 1, 0 }
   0xe   : > { %p2060_p9 = scmp.eq.s32.totalorder %s1686_s22, 0  ;;  %p1714_p10 = pnand %p1223_p7, %p160_p8 }
   0xf   : > { %s1629_s6 = smov [#allocation2]   ;;  %s1533_s11 = scalar_lea.hbm %s2057_s3, 1536 }
  0x10   : > { %s2066_s30 = scalar_select %p1714_p10, 1, 0 }
  0x11   : > { %s178_s7 = sshll.u32 %s1629_s6, 4  ;;  %p1457_p11 = pneg %p1714_p10  ;;  %s179_s7 = int_to_ptr.vmem [resolvable:$true] %s178_s7 }
  0x12   : > { %p1534_p13 = scmp.ne.s32.totalorder %s2057_s3, %s1533_s11  ;;  %p1540_p3 = scmp.lt.u32.totalorder %s1533_s11, %s2057_s3 }
  0x13   : > { %p1722_p12 = pnand %p2060_p9, %p1457_p11 }
  0x15   : > { %p1535_p0 = pneg %p1722_p12 }
  0x17   : > { %p1536_p1 = pnand %p1535_p0, %p1534_p13 }
  0x19   : > { %p1537_p2 = pneg %p1536_p1 }
  0x1b   : > { %p1542_p4 = pnand %p1540_p3, %p1537_p2 }
  0x1d   : > { %1545 = shalt.err (!%p1542_p4)
}
  0x1e   : > { %s1546_s16 = scalar_lea.vmem %s179_s7, 1536  ;;  %p1554_p9 = scmp.lt.s32.totalorder %s179_s7, %s179_s7 }
  0x1f   : > { %p1547_p7 = scmp.ne.s32.totalorder %s179_s7, %s1546_s16  ;;  %p1555_p6 = scmp.lt.s32.totalorder %s1546_s16, %s1546_s16 }
  0x21   : > { %p1549_p8 = pnand %p1547_p7, %p1535_p0  ;;  %p1556_p5 = por %p1555_p6, %p1554_p9 }
  0x23   : > { %p1550_p11 = pneg %p1549_p8 }
  0x25   : > { %p1557_p10 = pnand %p1556_p5, %p1550_p11 }
  0x27   : > { %1560 = shalt.err (!%p1557_p10)
}
  0x28   : > { %s1630_s17 = smov 64   ;;  %s1631_s23 = smov 4  }
  0x29   : > { %1460 = dma.hbm_to_vmem [thread:$0]  (!%p1722_p12), %s2057_s3, 1536, %s179_s7, [#allocation3], %s1630_s17, %s1630_s17, %s1631_s23  }
  0x2a   : > { %p2068_p13 = scmp.ne.s32.totalorder %s2066_s30, 0 }
  0x2b   : > { %p2069_p1 = scmp.eq.s32.totalorder (!%p2068_p13), %s1686_s22, 0 }
  0x2c   : > { %206 = sbr.rel (%p2068_p13) target bundleno = 588 (0x24c), region = 40 }
  0x33   : > { %1606 = dma.done.wait (%p2069_p1), [#allocation3], 1536   ;;  %p2070_p0 = pmov %p2069_p1 }
  0x34   : > { %s1229_s6 = sshll.u32 %s1686_s22, 3  ;;  %v1505_v0 = vld [vmem:[%s2055_s1] sm:$0xff]   ;;  %v1507_v2 = vld [vmem:[%s2055_s1 + $0x8] sm:$0xff]   ;;  %v1509_v4 = vld [vmem:[%s2055_s1 + $0x10] sm:$0xff]   ;;  %vm302_vm0 = vcmask 523264   ;;  %v576_v25 = vlaneseq  ;;  %s231_s26 = sand.u32 1, %s1619_s19  }
  0x35   : > { %1608 = vsyncadd (%p2070_p0), [#allocation3], 4294965760  ;;  %p235_p5 = scmp.lt.s32.totalorder %s1229_s6, 15  ;;  %v1506_v1 = vld [vmem:[%s2055_s1 + $0x20] sm:$0xff]   ;;  %1355 = vmatprep.subr.bf16.mxu0 %v1505_v0  ;;  %v1508_v3 = vld [vmem:[%s2055_s1 + $0x28] sm:$0xff]   ;;  %s1228_s10 = sshll.u32 %s231_s26, 6 }
  0x36   : > { %1356 = vmatpush3.bf16.msra.mxu0 %v1505_v0  ;;  %1371 = vmatprep.subr.bf16.mxu1 %v1506_v1  ;;  %v1510_v5 = vld [vmem:[%s2055_s1 + $0x30] sm:$0xff]   ;;  %v1511_v7 = vld [vmem:[%s2055_s1 + $0x18] sm:$0xff]   ;;  %v1515_v9 = vld [vmem:[%s2055_s1 + $0x40] sm:$0xff]   ;;  %v1803_v26 = vshrl.u32 %v576_v25, 7  ;;  %s1970_s8 = scalar_lea.vmem [#allocation5], %s1228_s10  ;;  %s1306_s11 = sshll.u32 %s1686_s22, 10 }
  0x37   : > { %s2102_s6 = smov (!%p235_p5, %s1229_s6), 15  ;;  %1357 = vmatprep.subr.bf16.mxu0 %v1507_v2  ;;  %1372 = vmatpush3.bf16.msra.mxu1 %v1506_v1  ;;  %v1513_v8 = vld [vmem:[%s2055_s1 + $0x38] sm:$0xff]   ;;  %v1516_v11 = vld [vmem:[%s2055_s1 + $0x48] sm:$0xff]   ;;  %v1519_v13 = vld [vmem:[%s2055_s1 + $0x50] sm:$0xff]   ;;  %s2005_s13 = scalar_lea.hbm %s2059_s5, %s1306_s11 }
  0x38   : > { %s1230_s30 = sshll.u32 %s2102_s6, 2  ;;  %1373 = vmatprep.subr.bf16.mxu1 %v1508_v3  ;;  %v1520_v15 = vld [vmem:[%s2055_s1 + $0x58] sm:$0xff]   ;;  %v1521_v16 = vld [vmem:[#allocation2] sm:$0xff]   ;;  %v1523_v18 = vld [vmem:[#allocation2 + $0x8] sm:$0xff]   ;;  %v579_v27 = vadd.s32 16, %v1803_v26  ;;  %vm617_vm1 = vcmp.lt.s32.totalorder %v1803_v26, 1 }
  0x39   : > { %s238_s25 = scalar_lea.vmem %s2054_s0, %s1230_s30  ;;  %v1522_v17 = vld [vmem:[#allocation2 + $0x20] sm:$0xff]   ;;  %v1524_v19 = vld [vmem:[#allocation2 + $0x28] sm:$0xff]   ;;  %v1525_v20 = vld [vmem:[#allocation2 + $0x10] sm:$0xff]   ;;  %v581_v34 = vadd.s32 32, %v1803_v26  ;;  %v583_v43 = vadd.s32 48, %v1803_v26  ;;  %v585_v51 = vand.u32 15, %v1803_v26 }
  0x3a   : > { %1358 = vmatpush3.bf16.msra.mxu0 %v1507_v2  ;;  %v1512_v6 = vld [vmem:[%s238_s25] sm:$0xff]   ;;  %v1514_v10 = vld [vmem:[%s238_s25 + $0x8] sm:$0xff]   ;;  %v1517_v12 = vld [vmem:[%s238_s25 + $0x10] sm:$0xff]   ;;  %v587_v29 = vand.u32 15, %v579_v27  ;;  %v582_v25 = vadd.s32 40, %v1803_v26  ;;  %vm2063_vm6 = vcmp.lt.s32.totalorder %v1803_v26, 7 }
  0x3b   : > { %1359 = vmatprep.subr.bf16.mxu0 %v1509_v4  ;;  %1374 = vmatpush3.bf16.msra.mxu1 %v1508_v3  ;;  %v1518_v14 = vld [vmem:[%s238_s25 + $0x18] sm:$0xff]   ;;  %v1526_v21 = vld [vmem:[#allocation2 + $0x30] sm:$0xff]   ;;  %v1800_v24 = vld [vmem:[#allocation2 + $0x40] sm:$0xff]   ;;  %v589_v48 = vand.u32 15, %v581_v34  ;;  %v591_v54 = vand.u32 15, %v583_v43  ;;  %vm1828_vm4 = vcmp.eq.s32.totalorder %v585_v51, 0 }
  0x3c   : > { %1375 = vmatprep.subr.bf16.mxu1 %v1510_v5  ;;  %1363 = vmatprep.mubr.msk.bf16.mxu0 %vm302_vm0, %v1512_v6  ;;  %v1527_v22 = vld [vmem:[#allocation2 + $0x18] sm:$0xff]   ;;  %vm1808_vm2 = vcmp.eq.s32.totalorder %v587_v29, 0  ;;  %s1148_s30 = sshll.u32 %s1970_s8, 4  ;;  %s2013_s22 = scalar_lea.sflag [#allocation4], %s231_s26  ;;  %s2007_s30 = int_to_ptr.vmem [resolvable:$true] %s1148_s30 }
  0x3d   : > { %1379 = vmatprep.mubr.msk.bf16.mxu1 %vm302_vm0, %v1512_v6  ;;  %v1528_v23 = vld [vmem:[#allocation2 + $0x38] sm:$0xff]   ;;  %vm1824_vm3 = vcmp.eq.s32.totalorder %v589_v48, 0  ;;  %vm1832_vm5 = vcmp.eq.s32.totalorder %v591_v54, 0  ;;  %s1561_s14 = scalar_lea.vmem %s2007_s30, 1024  ;;  %p2095_p9 = scmp.ne.s32.totalorder %s2064_s28, 0 }
  0x3e   : > { %1360 = vmatpush3.bf16.msra.mxu0 %v1509_v4  ;;  %p1562_p6 = scmp.ne.s32.totalorder %s2007_s30, %s1561_s14  ;;  %s1632_s15 = smov [#allocation5]  }
  0x3f   : > { %1361 = vmatprep.subr.bf16.mxu0 %v1511_v7  ;;  %1376 = vmatpush3.bf16.msra.mxu1 %v1510_v5  ;;  %s1565_s16 = sshll.u32 %s1632_s15, 4  ;;  %s1566_s16 = int_to_ptr.vmem [resolvable:$false] %s1565_s16 }
  0x40   : > { %1377 = vmatprep.subr.bf16.mxu1 %v1513_v8  ;;  %p1563_p10 = pnand %p1562_p6, %p2095_p9  ;;  %s1567_s17 = scalar_lea.vmem %s1566_s16, 2048 }
  0x41   : > { %p1568_p2 = scmp.lt.s32.totalorder %s2007_s30, %s1566_s16  ;;  %p1569_p3 = scmp.lt.s32.totalorder %s1567_s17, %s1561_s14 }
  0x42   : > { %1362 = vmatpush3.bf16.msra.mxu0 %v1511_v7  ;;  %p1564_p12 = pneg %p1563_p10 }
  0x43   : > { %1378 = vmatpush3.bf16.msra.mxu1 %v1513_v8  ;;  %1387 = vmatprep.subr.bf16.mxu0 %v1515_v9  ;;  %p1570_p4 = por %p1569_p3, %p1568_p2 }
  0x44   : > { %1403 = vmatprep.subr.bf16.mxu1 %v1521_v16 }
  0x45   : > { %1364 = vmatmul.mubr.msk.bf16.vlgmr.msra.gmra.mrb[0].mxu0 %vm302_vm0, %v1514_v10  ;;  %p1571_p7 = pnand %p1570_p4, %p1564_p12 }
  0x46   : > { %1388 = vmatpush3.bf16.msra.mxu0 %v1515_v9  ;;  %1380 = vmatmul.mubr.msk.bf16.vlgmr.msra.gmra.mrb[0].mxu1 %vm302_vm0, %v1514_v10 }
  0x47   : > { %1389 = vmatprep.subr.bf16.mxu0 %v1516_v11  ;;  %1367 = vmatprep.mubr.msk.bf16.mxu0 %vm302_vm0, %v1517_v12 }
  0x48   : > { %1383 = vmatprep.mubr.msk.bf16.mxu1 %vm302_vm0, %v1517_v12  ;;  %1404 = vmatpush3.bf16.msra.mxu1 %v1521_v16 }
  0x49   : > { %1405 = vmatprep.subr.bf16.mxu1 %v1523_v18 }
  0x4a   : > { %1390 = vmatpush3.bf16.msra.mxu0 %v1516_v11 }
  0x4b   : > { %1391 = vmatprep.subr.bf16.mxu0 %v1519_v13 }
  0x4c   : > { %1406 = vmatpush3.bf16.msra.mxu1 %v1523_v18 }
  0x4d   : > { %1368 = vmatmul.mubr.msk.bf16.gmra.mrb[4].mxu0 %vm302_vm0, %v1518_v14  ;;  %1407 = vmatprep.subr.bf16.mxu1 %v1525_v20 }
  0x4e   : > { %1392 = vmatpush3.bf16.msra.mxu0 %v1519_v13  ;;  %1384 = vmatmul.mubr.msk.bf16.gmra.mrb[4].mxu1 %vm302_vm0, %v1518_v14 }
  0x4f   : > { %1393 = vmatprep.subr.bf16.mxu0 %v1520_v15  ;;  %1395 = vmatprep.mubr.msk.bf16.mxu0 %vm302_vm0, %v1512_v6  ;;  %v578_v6 = vadd.s32 8, %v1803_v26 }
  0x50   : > { %1408 = vmatpush3.bf16.msra.mxu1 %v1525_v20 }
  0x51   : > { %1409 = vmatprep.subr.bf16.mxu1 %v1527_v22  ;;  %v586_v20 = vand.u32 15, %v578_v6 }
  0x52   : > { %1394 = vmatpush3.bf16.msra.mxu0 %v1520_v15 }
  0x53   : > { %1419 = vmatprep.subr.bf16.mxu0 %v1522_v17  ;;  %vm1859_vm7 = vcmp.eq.s32.totalorder %v586_v20, 15 }
  0x54   : > { %1410 = vmatpush3.bf16.msra.mxu1 %v1527_v22  ;;  %v580_v22 = vadd.s32 24, %v1803_v26 }
  0x55   : > { %1396 = vmatmul.mubr.msk.bf16.vlgmr.msra.gmra.mrb[8].mxu0 %vm302_vm0, %v1514_v10  ;;  %1435 = vmatprep.subr.bf16.mxu1 %v1800_v24 }
  0x56   : > { %1399 = vmatprep.mubr.msk.bf16.mxu0 %vm302_vm0, %v1517_v12  ;;  %1420 = vmatpush3.bf16.msra.mxu0 %v1522_v17 }
  0x57   : > { %1421 = vmatprep.subr.bf16.mxu0 %v1524_v19 }
  0x5a   : > { %1422 = vmatpush3.bf16.msra.mxu0 %v1524_v19 }
  0x5b   : > { %1423 = vmatprep.subr.bf16.mxu0 %v1526_v21 }
  0x5d   : > { %1400 = vmatmul.mubr.msk.bf16.gmra.mrb[12].mxu0 %vm302_vm0, %v1518_v14 }
  0x5e   : > { %1424 = vmatpush3.bf16.msra.mxu0 %v1526_v21 }
  0x5f   : > { %1425 = vmatprep.subr.bf16.mxu0 %v1528_v23 }
  0x62   : > { %1426 = vmatpush3.bf16.msra.mxu0 %v1528_v23  ;;  %v584_v23 = vadd.s32 56, %v1803_v26 }
 0x118   : > { %v1365_v28 = vpop.f32.mrb[0].mxu0 }
 0x119   : > { %v349_v30 = vpop.f32.mrb[1].mxu0  ;;  %v1381_v31 = vpop.f32.mrb[0].mxu1  ;;  %v611_v35 = vrot.slane %v1365_v28, 7 }
 0x11a   : > { %v1366_v32 = vpop.f32.mrb[2].mxu0  ;;  %v447_v33 = vpop.f32.mrb[1].mxu1  ;;  %v609_v39 = vrot.slane %v349_v30, 7 }
 0x11b   : > { %v612_v36 = vrot.slane %v1366_v32, 7  ;;  %v352_v37 = vpop.f32.mrb[3].mxu0  ;;  %v1382_v38 = vpop.f32.mrb[2].mxu1 }
 0x11c   : > { %v610_v40 = vrot.slane %v352_v37, 7  ;;  %v450_v42 = vpop.f32.mrb[3].mxu1  ;;  %v592_v37 = vand.u32 15, %v584_v23 }
 0x11d   : > { %v622_v44 = vsel %vm617_vm1, %v611_v35, %v612_v36 }
 0x11e   : > { %v623_v45 = vsel %vm617_vm1, %v610_v40, %v611_v35  ;;  %v1817_v46 = vadd.f32 %v1382_v38, %v622_v44  ;;  %v624_v47 = vsel %vm617_vm1, %v609_v39, %v610_v40  ;;  %v1275_v35 = vld [vmem:[%s2056_s2] ss:$0 sm:$0xff]  ;;  %v590_v38 = vand.u32 15, %v582_v25 }
 0x11f   : > { %v628_v49 = vsel %vm1808_vm2, 0.0, %v623_v45  ;;  %v660_v50 = vadd.f32 %v624_v47, %v450_v42  ;;  %vm1878_vm9 = vcmp.eq.s32.totalorder %v592_v37, 15 }
 0x120   : > { %v661_v52 = vadd.f32 %v1381_v31, %v628_v49  ;;  %v1369_v53 = vpop.f32.mrb[4].mxu0  ;;  %vm1882_vm10 = vcmp.eq.s32.totalorder %v590_v38, 15 }
 0x121   : > { %v365_v55 = vpop.f32.mrb[5].mxu0  ;;  %v1385_v56 = vpop.f32.mrb[4].mxu1  ;;  %v615_v61 = vrot.slane %v1369_v53, 7 }
 0x122   : > { %v613_v57 = vrot.slane %v365_v55, 7  ;;  %v1370_v58 = vpop.f32.mrb[6].mxu0  ;;  %v463_v59 = vpop.f32.mrb[5].mxu1 }
 0x123   : > { %v616_v63 = vrot.slane %v1370_v58, 7  ;;  %v368_v0 = vpop.f32.mrb[7].mxu0  ;;  %v1386_v1 = vpop.f32.mrb[6].mxu1 }
 0x124   : > { %v614_v2 = vrot.slane %v368_v0, 7  ;;  %v621_v4 = vsel %vm617_vm1, %v612_v36, %v613_v57  ;;  %v466_v5 = vpop.f32.mrb[7].mxu1  ;;  %v588_v36 = vand.u32 15, %v580_v22 }
 0x125   : > { %v625_v7 = vsel %vm617_vm1, %v616_v63, %v609_v39  ;;  %v630_v8 = vsel %vm1824_vm3, 0.0, %v621_v4  ;;  %v618_v9 = vsel %vm617_vm1, %v615_v61, %v616_v63 }
 0x126   : > { %v626_v10 = vsel %vm1828_vm4, 0.0, %v625_v7  ;;  %v619_v11 = vsel %vm617_vm1, %v614_v2, %v615_v61  ;;  %v1849_v12 = vadd.f32 %v630_v8, %v463_v59  ;;  %v666_v13 = vadd.f32 %v1386_v1, %v618_v9 }
 0x127   : > { %v659_v14 = vadd.f32 %v626_v10, %v447_v33  ;;  %v632_v15 = vsel %vm1832_vm5, 0.0, %v619_v11  ;;  %v620_v16 = vsel %vm617_vm1, %v613_v57, %v614_v2  ;;  %vm1874_vm8 = vcmp.eq.s32.totalorder %v588_v36, 15 }
 0x128   : > { %v665_v17 = vadd.f32 %v1385_v56, %v632_v15  ;;  %v664_v18 = vadd.f32 %v620_v16, %v466_v5  ;;  %v1397_v19 = vpop.f32.mrb[8].mxu0 }
 0x129   : > { %v545_v21 = vpop.f32.mrb[9].mxu0  ;;  %v636_v28 = vrot.slane %v1397_v19, 1 }
 0x12a   : > { %v1398_v27 = vpop.f32.mrb[10].mxu0  ;;  %v634_v31 = vrot.slane %v545_v21, 1 }
 0x12b   : > { %v637_v29 = vrot.slane %v1398_v27, 1  ;;  %v548_v30 = vpop.f32.mrb[11].mxu0 }
 0x12c   : > { %v635_v33 = vrot.slane %v548_v30, 1 }
 0x12d   : > { %v647_v34 = vsel %vm2063_vm6, %v636_v28, %v637_v29 }
 0x12e   : > { %v669_v39 = vadd.f32 %v661_v52, %v647_v34  ;;  %v648_v40 = vsel %vm2063_vm6, %v635_v33, %v636_v28  ;;  %v649_v42 = vsel %vm2063_vm6, %v634_v31, %v635_v33 }
 0x12f   : > { %v652_v43 = vsel %vm1859_vm7, 0.0, %v648_v40  ;;  %v667_v44 = vadd.f32 %v659_v14, %v649_v42  ;;  %v1531_v42 = vld [vmem:[#allocation2 + $0x50] sm:$0xff]  }
 0x130   : > { %v684_v45 = vadd.f32 %v1275_v35, %v669_v39  ;;  %v668_v47 = vadd.f32 %v660_v50, %v652_v43  ;;  %v1401_v48 = vpop.f32.mrb[12].mxu0  ;;  %v1532_v43 = vld [vmem:[#allocation2 + $0x58] sm:$0xff]  }
 0x131   : > { %v682_v49 = vadd.f32 %v1275_v35, %v667_v44  ;;  %v561_v51 = vpop.f32.mrb[13].mxu0  ;;  %v640_v56 = vrot.slane %v1401_v48, 1 }
 0x132   : > { %vm692_vm11 = vcmp.ge.f32.partialorder %v684_v45, 0.0  ;;  %v683_v55 = vadd.f32 %v1275_v35, %v668_v47  ;;  %v638_v57 = vrot.slane %v561_v51, 1  ;;  %v1402_v50 = vpop.f32.mrb[14].mxu0  ;;  %v700_v58 = vmul.f32 0.2, %v684_v45 }
 0x133   : > { %v698_v59 = vmul.f32 0.2, %v682_v49  ;;  %v641_v61 = vrot.slane %v1402_v50, 1  ;;  %v564_v63 = vpop.f32.mrb[15].mxu0  ;;  %vm690_vm12 = vcmp.ge.f32.partialorder %v682_v49, 0.0 }
 0x134   : > { %v646_v0 = vsel %vm2063_vm6, %v637_v29, %v638_v57  ;;  %v639_v1 = vrot.slane %v564_v63, 1  ;;  %vm691_vm13 = vcmp.ge.f32.partialorder %v683_v55, 0.0  ;;  %v699_v6 = vmul.f32 0.2, %v683_v55 }
 0x135   : > { %v654_v2 = vsel %vm1874_vm8, 0.0, %v646_v0  ;;  %v643_v4 = vsel %vm2063_vm6, %v640_v56, %v641_v61  ;;  %v650_v5 = vsel %vm2063_vm6, %v641_v61, %v634_v31  ;;  %v706_v16 = vsel %vm690_vm12, %v682_v49, %v698_v59 }
 0x136   : > { %v670_v7 = vadd.f32 %v1817_v46, %v654_v2  ;;  %v658_v8 = vsel %vm1878_vm9, 0.0, %v650_v5  ;;  %v673_v9 = vadd.f32 %v665_v17, %v643_v4  ;;  %v644_v10 = vsel %vm2063_vm6, %v639_v1, %v640_v56 }
 0x137   : > { %v674_v11 = vadd.f32 %v666_v13, %v658_v8  ;;  %v645_v14 = vsel %vm2063_vm6, %v638_v57, %v639_v1  ;;  %v656_v15 = vsel %vm1882_vm10, 0.0, %v644_v10  ;;  %v708_v22 = vsel %vm692_vm11, %v684_v45, %v700_v58 }
 0x138   : > { %v685_v19 = vadd.f32 %v1275_v35, %v670_v7  ;;  %v688_v20 = vadd.f32 %v1275_v35, %v673_v9  ;;  %v671_v21 = vadd.f32 %v1849_v12, %v645_v14  ;;  %v672_v46 = vadd.f32 %v664_v18, %v656_v15  ;;  %v1530_v18 = vld [vmem:[#allocation2 + $0x48] sm:$0xff]  }
 0x139   : > { %v689_v23 = vadd.f32 %v1275_v35, %v674_v11  ;;  %v707_v17 = vsel %vm691_vm13, %v683_v55, %v699_v6 }
 0x13a   : > { %vm693_vm14 = vcmp.ge.f32.partialorder %v685_v19, 0.0  ;;  %v701_v25 = vmul.f32 0.2, %v685_v19  ;;  %v704_v13 = vmul.f32 0.2, %v688_v20  ;;  %v686_v27 = vadd.f32 %v1275_v35, %v671_v21 }
 0x13b   : > { %v687_v28 = vadd.f32 %v1275_v35, %v672_v46  ;;  %v714_v29 = vpack.c.bf16 %v707_v17, %v706_v16  ;;  %vm696_vm15 = vcmp.ge.f32.partialorder %v688_v20, 0.0  ;;  %vm697_vm6 = vcmp.ge.f32.partialorder %v689_v23, 0.0 }
 0x13c   : > { %v709_v30 = vsel %vm693_vm14, %v685_v19, %v701_v25  ;;  %v702_v31 = vmul.f32 0.2, %v686_v27  ;;  %vm694_vm12 = vcmp.ge.f32.partialorder %v686_v27, 0.0  ;;  %v705_v33 = vmul.f32 0.2, %v689_v23 }
 0x13d   : > { %v715_v34 = vpack.c.bf16 %v709_v30, %v708_v22  ;;  %1411 = vmatprep.mubr.msk.bf16.mxu1 %vm302_vm0, %v714_v29  ;;  %1427 = vmatprep.mubr.msk.bf16.mxu0 %vm302_vm0, %v714_v29  ;;  %vm695_vm11 = vcmp.ge.f32.partialorder %v687_v28, 0.0  ;;  %v703_v12 = vmul.f32 0.2, %v687_v28  ;;  %v712_v36 = vsel %vm696_vm15, %v688_v20, %v704_v13 }
 0x13e   : > { %v710_v37 = vsel %vm694_vm12, %v686_v27, %v702_v31  ;;  %v713_v38 = vsel %vm697_vm6, %v689_v23, %v705_v33 }
 0x13f   : > { %1412 = vmatmul.mubr.msk.bf16.vlgmr.msra.gmra.mrb[8].mxu1 %vm302_vm0, %v715_v34  ;;  %1428 = vmatmul.mubr.msk.bf16.vlgmr.msra.gmra.mrb[16].mxu0 %vm302_vm0, %v715_v34  ;;  %v711_v35 = vsel %vm695_vm11, %v687_v28, %v703_v12  ;;  %v717_v39 = vpack.c.bf16 %v713_v38, %v712_v36  ;;  %v1955_v38 = vld [vmem:[%s2058_s4] ss:$0 sm:$0xff] }
 0x140   : > { %1436 = vmatpush3.bf16.msra.mxu1 %v1800_v24  ;;  %v716_v40 = vpack.c.bf16 %v711_v35, %v710_v37 }
 0x141   : > { %1437 = vmatprep.subr.bf16.mxu1 %v1530_v18 }
 0x142   : > { %1415 = vmatprep.mubr.msk.bf16.mxu1 %vm302_vm0, %v716_v40  ;;  %1431 = vmatprep.mubr.msk.bf16.mxu0 %vm302_vm0, %v716_v40 }
 0x144   : > { %1438 = vmatpush3.bf16.msra.mxu1 %v1530_v18 }
 0x145   : > { %1439 = vmatprep.subr.bf16.mxu1 %v1531_v42 }
 0x147   : > { %1416 = vmatmul.mubr.msk.bf16.gmra.mrb[12].mxu1 %vm302_vm0, %v717_v39  ;;  %1432 = vmatmul.mubr.msk.bf16.gmra.mrb[20].mxu0 %vm302_vm0, %v717_v39 }
 0x148   : > { %1440 = vmatpush3.bf16.msra.mxu1 %v1531_v42  ;;  %1443 = vmatprep.mubr.msk.bf16.mxu1 %vm302_vm0, %v714_v29 }
 0x149   : > { %1441 = vmatprep.subr.bf16.mxu1 %v1532_v43 }
 0x14c   : > { %1442 = vmatpush3.bf16.msra.mxu1 %v1532_v43 }
 0x14f   : > { %1444 = vmatmul.mubr.msk.bf16.vlgmr.msra.gmra.mrb[16].mxu1 %vm302_vm0, %v715_v34 }
 0x150   : > { %1447 = vmatprep.mubr.msk.bf16.mxu1 %vm302_vm0, %v716_v40 }
 0x157   : > { %1448 = vmatmul.mubr.msk.bf16.gmra.mrb[20].mxu1 %vm302_vm0, %v717_v39  ;;  %vm2087_vm0 = vcmp.lt.s32.totalorder %v1803_v26, 7 }
 0x158   : > { %vm2090_vm6 = vmmov %vm2087_vm0 }
 0x159   : > { %vm2092_vm13 = vmmov %vm2087_vm0 }
 0x15a   : > { %vm2094_vm14 = vmmov %vm2087_vm0 }
 0x212   : > { %v1413_v24 = vpop.f32.mrb[8].mxu1  ;;  %v1429_v44 = vpop.f32.mrb[16].mxu0 }
 0x213   : > { %v796_v45 = vpop.f32.mrb[9].mxu1  ;;  %v894_v47 = vpop.f32.mrb[17].mxu0  ;;  %v1025_v51 = vrot.slane %v1413_v24, 7 }
 0x214   : > { %v1414_v48 = vpop.f32.mrb[10].mxu1  ;;  %v1430_v49 = vpop.f32.mrb[18].mxu0  ;;  %v1023_v50 = vrot.slane %v796_v45, 7 }
 0x215   : > { %v1026_v55 = vrot.slane %v1414_v48, 7  ;;  %v799_v56 = vpop.f32.mrb[11].mxu1  ;;  %v897_v57 = vpop.f32.mrb[19].mxu0 }
 0x216   : > { %v1024_v58 = vrot.slane %v799_v56, 7 }
 0x217   : > { %v1035_v59 = vsel %vm617_vm1, %v1025_v51, %v1026_v55 }
 0x218   : > { %v1921_v61 = vadd.f32 %v1430_v49, %v1035_v59  ;;  %v1036_v63 = vsel %vm617_vm1, %v1024_v58, %v1025_v51  ;;  %v1037_v0 = vsel %vm617_vm1, %v1023_v50, %v1024_v58 }
 0x219   : > { %v1041_v1 = vsel %vm1808_vm2, 0.0, %v1036_v63  ;;  %v1072_v2 = vadd.f32 %v1037_v0, %v897_v57  ;;  %vm2089_vm2 = vmmov %vm2087_vm0 }
 0x21a   : > { %v1073_v4 = vadd.f32 %v1429_v44, %v1041_v1  ;;  %v1417_v5 = vpop.f32.mrb[12].mxu1  ;;  %v1433_v6 = vpop.f32.mrb[20].mxu0 }
 0x21b   : > { %v812_v7 = vpop.f32.mrb[13].mxu1  ;;  %v910_v8 = vpop.f32.mrb[21].mxu0  ;;  %v1029_v14 = vrot.slane %v1417_v5, 7 }
 0x21c   : > { %v1027_v9 = vrot.slane %v812_v7, 7  ;;  %v1418_v10 = vpop.f32.mrb[14].mxu1  ;;  %v1434_v11 = vpop.f32.mrb[22].mxu0 }
 0x21d   : > { %v1030_v15 = vrot.slane %v1418_v10, 7  ;;  %v815_v16 = vpop.f32.mrb[15].mxu1  ;;  %v913_v19 = vpop.f32.mrb[23].mxu0 }
 0x21e   : > { %v1034_v20 = vsel %vm617_vm1, %v1026_v55, %v1027_v9  ;;  %v1028_v21 = vrot.slane %v815_v16, 7 }
 0x21f   : > { %v1043_v41 = vsel %vm1824_vm3, 0.0, %v1034_v20  ;;  %v1038_v46 = vsel %vm617_vm1, %v1030_v15, %v1023_v50  ;;  %v1031_v22 = vsel %vm617_vm1, %v1029_v14, %v1030_v15 }
 0x220   : > { %v1937_v23 = vadd.f32 %v1043_v41, %v910_v8  ;;  %v1039_v17 = vsel %vm1828_vm4, 0.0, %v1038_v46  ;;  %v1078_v25 = vadd.f32 %v1434_v11, %v1031_v22  ;;  %v1032_v13 = vsel %vm617_vm1, %v1028_v21, %v1029_v14 }
 0x221   : > { %v1071_v27 = vadd.f32 %v1039_v17, %v894_v47  ;;  %v1045_v60 = vsel %vm1832_vm5, 0.0, %v1032_v13  ;;  %v1033_v28 = vsel %vm617_vm1, %v1027_v9, %v1028_v21  ;;  %vm2088_vm1 = vmmov %vm2087_vm0 }
 0x222   : > { %v1077_v29 = vadd.f32 %v1433_v6, %v1045_v60  ;;  %v1947_v30 = vadd.f32 %v1033_v28, %v913_v19  ;;  %v1445_v31 = vpop.f32.mrb[16].mxu1 }
 0x223   : > { %v992_v33 = vpop.f32.mrb[17].mxu1  ;;  %v1049_v34 = vrot.slane %v1445_v31, 1 }
 0x224   : > { %v1446_v62 = vpop.f32.mrb[18].mxu1  ;;  %v1047_v36 = vrot.slane %v992_v33, 1 }
 0x225   : > { %v1050_v12 = vrot.slane %v1446_v62, 1  ;;  %v995_v18 = vpop.f32.mrb[19].mxu1 }
 0x226   : > { %v1048_v37 = vrot.slane %v995_v18, 1 }
 0x227   : > { %v1059_v3 = vsel %vm2087_vm0, %v1049_v34, %v1050_v12 }
 0x228   : > { %v1081_v35 = vadd.f32 %v1073_v4, %v1059_v3  ;;  %v1060_v39 = vsel %vm2088_vm1, %v1048_v37, %v1049_v34  ;;  %v1061_v40 = vsel %vm2089_vm2, %v1047_v36, %v1048_v37 }
 0x229   : > { %v1064_v42 = vsel %vm1859_vm7, 0.0, %v1060_v39  ;;  %v1079_v43 = vadd.f32 %v1071_v27, %v1061_v40  ;;  %vm2091_vm7 = vmmov %vm2087_vm0 }
 0x22a   : > { %v1096_v24 = vadd.f32 %v1955_v38, %v1081_v35  ;;  %v1080_v44 = vadd.f32 %v1072_v2, %v1064_v42  ;;  %v1449_v45 = vpop.f32.mrb[20].mxu1 }
 0x22b   : > { %v1094_v47 = vadd.f32 %v1955_v38, %v1079_v43  ;;  %v1008_v48 = vpop.f32.mrb[21].mxu1  ;;  %v1053_v50 = vrot.slane %v1449_v45, 1 }
 0x22c   : > { %vm1104_vm3 = vcmp.ge.f32.partialorder %v1096_v24, 0.0  ;;  %v1112_v49 = vmul.f32 0.2, %v1096_v24  ;;  %v1095_v51 = vadd.f32 %v1955_v38, %v1080_v44  ;;  %v1051_v55 = vrot.slane %v1008_v48, 1  ;;  %v1450_v56 = vpop.f32.mrb[22].mxu1 }
 0x22d   : > { %vm1102_vm4 = vcmp.ge.f32.partialorder %v1094_v47, 0.0  ;;  %v1110_v57 = vmul.f32 0.2, %v1094_v47  ;;  %v1054_v58 = vrot.slane %v1450_v56, 1  ;;  %v1011_v32 = vpop.f32.mrb[23].mxu1 }
 0x22e   : > { %v1120_v59 = vsel %vm1104_vm3, %v1096_v24, %v1112_v49  ;;  %vm1103_vm5 = vcmp.ge.f32.partialorder %v1095_v51, 0.0  ;;  %v1111_v63 = vmul.f32 0.2, %v1095_v51  ;;  %v1058_v0 = vsel %vm2090_vm6, %v1050_v12, %v1051_v55 }
 0x22f   : > { %1128 = vst [vmem:[%s1970_s8 + $0x10] sm:$0xff] %v1120_v59  ;;  %v1118_v1 = vsel %vm1102_vm4, %v1094_v47, %v1110_v57  ;;  %v1066_v2 = vsel %vm1874_vm8, 0.0, %v1058_v0  ;;  %v1055_v4 = vsel %vm2091_vm7, %v1053_v50, %v1054_v58  ;;  %v1062_v5 = vsel %vm2092_vm13, %v1054_v58, %v1047_v36  ;;  %vm2093_vm8 = vmmov %vm2087_vm0 }
 0x230   : > { %v1119_v6 = vsel %vm1103_vm5, %v1095_v51, %v1111_v63  ;;  %1126 = vst [vmem:[%s1970_s8] sm:$0xff] %v1118_v1  ;;  %v1082_v7 = vadd.f32 %v1921_v61, %v1066_v2  ;;  %v1070_v8 = vsel %vm1878_vm9, 0.0, %v1062_v5  ;;  %v1085_v9 = vadd.f32 %v1077_v29, %v1055_v4 }
 0x231   : > { %1127 = vst [vmem:[%s1970_s8 + $0x8] sm:$0xff] %v1119_v6  ;;  %v1086_v10 = vadd.f32 %v1078_v25, %v1070_v8  ;;  %v1052_v11 = vrot.slane %v1011_v32, 1 }
 0x232   : > { %v1097_v53 = vadd.f32 %v1955_v38, %v1082_v7  ;;  %v1100_v14 = vadd.f32 %v1955_v38, %v1085_v9 }
 0x233   : > { %v1101_v15 = vadd.f32 %v1955_v38, %v1086_v10  ;;  %v1056_v16 = vsel %vm2093_vm8, %v1052_v11, %v1053_v50  ;;  %v1057_v61 = vsel %vm2094_vm14, %v1051_v55, %v1052_v11 }
 0x234   : > { %vm1105_vm9 = vcmp.ge.f32.partialorder %v1097_v53, 0.0  ;;  %v1113_v52 = vmul.f32 0.2, %v1097_v53  ;;  %vm1108_vm15 = vcmp.ge.f32.partialorder %v1100_v14, 0.0  ;;  %v1116_v19 = vmul.f32 0.2, %v1100_v14 }
 0x235   : > { %vm1109_vm12 = vcmp.ge.f32.partialorder %v1101_v15, 0.0  ;;  %v1117_v20 = vmul.f32 0.2, %v1101_v15  ;;  %v1068_v21 = vsel %vm1882_vm10, 0.0, %v1056_v16  ;;  %v1083_v41 = vadd.f32 %v1937_v23, %v1057_v61 }
 0x236   : > { %v1121_v46 = vsel %vm1105_vm9, %v1097_v53, %v1113_v52  ;;  %v1124_v22 = vsel %vm1108_vm15, %v1100_v14, %v1116_v19  ;;  %v1084_v17 = vadd.f32 %v1947_v30, %v1068_v21 }
 0x237   : > { %1129 = vst [vmem:[%s1970_s8 + $0x18] sm:$0xff] %v1121_v46  ;;  %v1125_v26 = vsel %vm1109_vm12, %v1101_v15, %v1117_v20  ;;  %1132 = vst [vmem:[%s1970_s8 + $0x30] sm:$0xff] %v1124_v22  ;;  %v1098_v25 = vadd.f32 %v1955_v38, %v1083_v41 }
 0x238   : > { %1133 = vst [vmem:[%s1970_s8 + $0x38] sm:$0xff] %v1125_v26  ;;  %v1099_v54 = vadd.f32 %v1955_v38, %v1084_v17 }
 0x239   : > { %vm1106_vm10 = vcmp.ge.f32.partialorder %v1098_v25, 0.0  ;;  %v1114_v23 = vmul.f32 0.2, %v1098_v25 }
 0x23a   : > { %vm1107_vm11 = vcmp.ge.f32.partialorder %v1099_v54, 0.0  ;;  %v1115_v13 = vmul.f32 0.2, %v1099_v54 }
 0x23b   : > { %v1122_v27 = vsel %vm1106_vm10, %v1098_v25, %v1114_v23 }
 0x23c   : > { %v1123_v60 = vsel %vm1107_vm11, %v1099_v54, %v1115_v13  ;;  %1130 = vst [vmem:[%s1970_s8 + $0x20] sm:$0xff] %v1122_v27 }
 0x23d   : > { %1131 = vst [vmem:[%s1970_s8 + $0x28] sm:$0xff] %v1123_v60 }
 0x23e   : > { %1574 = shalt.err (!%p1571_p7)
}
 0x23f   : > { %s1575_s23 = scalar_lea.hbm %s2005_s13, 1024  ;;  %s1579_s6 = scalar_lea.hbm %s2059_s5, 2048 }
 0x240   : > { %p1576_p8 = scmp.ne.s32.totalorder %s2005_s13, %s1575_s23  ;;  %p1580_p1 = scmp.lt.u32.totalorder %s2005_s13, %s2059_s5 }
 0x241   : > { %p1581_p0 = scmp.lt.u32.totalorder %s1579_s6, %s1575_s23  ;;  %p1583_p6 = scmp.lt.u32.totalorder %s1575_s23, %s2005_s13 }
 0x242   : > { %p1577_p11 = pnand %p1576_p8, %p2095_p9 }
 0x243   : > { %p1582_p5 = por %p1581_p0, %p1580_p1 }
 0x244   : > { %p1578_p13 = pneg %p1577_p11 }
 0x245   : > { %p1584_p10 = por %p1583_p6, %p1582_p5 }
 0x247   : > { %p1585_p12 = pnand %p1584_p10, %p1578_p13 }
 0x249   : > { %1588 = shalt.err (!%p1585_p12)
}
 0x24a   : > { %s1633_s8 = smov 128   ;;  %s1634_s11 = smov 8  }
 0x24b   : > { %1455 = dma.vmem_to_hbm [thread:$0]  (%p2095_p9), %s2007_s30, 1024, %s2005_s13, %s2013_s22, %s1633_s8, %s1633_s8, %s1634_s11  }
 0x24c PF: > { %p1467_p2 = scmp.ge.s32.totalorder %s1627_s21, 2  ;;  %s1163_s7 = sand.u32 1, %s1615_s18  }
 0x24d   : > { %p2096_p3 = scmp.ne.s32.totalorder %s2065_s29, 0  ;;  %s1164_s12 = scalar_lea.sflag [#allocation4], %s1163_s7 }
 0x24f   : > { %p1462_p4 = pnand %p1467_p2, %p2096_p3 }
 0x251   : > { %1610 = dma.done.wait (!%p1462_p4), %s1164_s12, 1024  }
 0x252   : > { %1612 = vsyncadd (!%p1462_p4), %s1164_s12, 4294966272  ;;  %p16_p7 = scmp.ge.s32.totalorder %s1690_s24, 4   ;;  %s2097_s18 = smov %s1619_s19 }
 0x253   : > { %s2098_s19 = smov %s1623_s20  ;;  %s2099_s20 = smov %s1701_s27 }
 0x254   : > { %s2100_s21 = smov %s1690_s24  ;;  %18 = sbr.rel (!%p16_p7) target bundleno = 4 (0x4), region = 84 }
 0x25b   :  { %1169 = vsyncpa [#allocation3], 1 }
 0x25c   :  { %1171 = vsyncpa [#allocation3 + $0x1], 1 }
 0x25d   :  { %1172 = vsyncpa [#allocation4], 1 }
 0x25e   :  { %1174 = vsyncpa [#allocation4 + $0x1], 1 }

</bundles_post_ra>
